<compile_context>
chip_gen: v7x
topology: tpu7x:2x2x1
jax: 0.10.0
libtpu: 0.0.40
codegen_flags: <defaults>
</compile_context>

<pallas_src>
import jax
import jax.numpy as jnp
from jax.experimental import pallas as pl
from jax.experimental.pallas import tpu as pltpu


def _round_up(n, m):
    return ((n + m - 1) // m) * m


def mlp_kernel(x_ref, w1_ref, b1_ref, w2_ref, b2_ref, o_ref):
    """Fused Linear -> ReLU -> Linear for one batch tile."""
    x = x_ref[...].astype(jnp.float32)       # (TILE_B, n_in), n_in tiny (e.g. 2)
    w1 = w1_ref[...]                         # (n_in, Hp) f32, Hp lane-dense
    n_in = x.shape[1]

    # ---- Layer 1 ----
    # With K = n_in = 2 the MXU systolic array would be >98% idle; a couple of
    # VPU broadcast-FMAs (statically unrolled) finish in a handful of bundles.
    # Guard: for wider inputs, fall back to the MXU instead of a long unroll.
    if n_in <= 16:
        h = x[:, 0:1] * w1[0:1, :]
        for k in range(1, n_in):             # static unroll (n_in known at trace time)
            h = h + x[:, k:k + 1] * w1[k:k + 1, :]
    else:
        h = jnp.dot(x, w1, preferred_element_type=jnp.float32)
    h = jnp.maximum(h + b1_ref[...], 0.0)    # bias broadcasts over batch tile; f32

    # ---- Layer 2 on the MXU ----
    # bf16 operands (MXU-native on v5e/v6e/v7x), f32 accumulate, lane-dense
    # K = Hp contraction and Op-wide unmasked stores.
    y = jnp.dot(h.astype(w2_ref.dtype), w2_ref[...],
                preferred_element_type=jnp.float32)
    y = y + b2_ref[...]
    o_ref[...] = y.astype(o_ref.dtype)


def prepare_padded_params(w1, b1, w2, b2, *, mxu_dtype=jnp.bfloat16):
    """Pad params ONCE to lane-dense (multiple-of-128) feature dims.

    Zero padding is exact: padded hidden units see 0 weight and 0 bias ->
    relu(0) = 0 -> contribute nothing through the zero-padded w2 rows, and
    padded output columns are sliced away by the caller.
    Returns (padded_params, (n_hidden, n_output)).
    """
    n_input, n_hidden = w1.shape
    n_output = w2.shape[1]
    Hp = _round_up(n_hidden, 128)
    Op = _round_up(n_output, 128)

    w1_p = jnp.zeros((n_input, Hp), jnp.float32).at[:, :n_hidden].set(
        w1.astype(jnp.float32))
    b1_p = jnp.zeros((1, Hp), jnp.float32).at[0, :n_hidden].set(
        b1.astype(jnp.float32))
    w2_p = jnp.zeros((Hp, Op), mxu_dtype).at[:n_hidden, :n_output].set(
        w2.astype(mxu_dtype))
    b2_p = jnp.zeros((1, Op), jnp.float32).at[0, :n_output].set(
        b2.astype(jnp.float32))
    return (w1_p, b1_p, w2_p, b2_p), (n_hidden, n_output)


def classification_forward(x, padded_params, n_output, *, max_tile_b=1024):
    """x: (B, n_input) f32; padded_params from prepare_padded_params().
       Returns (B, n_output) f32."""
    w1_p, b1_p, w2_p, b2_p = padded_params
    B, n_input = x.shape
    Hp = w1_p.shape[1]
    Op = w2_p.shape[1]

    # Batch rounded only to a multiple of 8 (sublane). For small batches this
    # is a single grid step (grid=(1,)); large batches fall back to a
    # parallel-tiled batch grid.
    Bp = _round_up(B, 8)
    if Bp <= max_tile_b:
        tile_b = Bp
    else:
        tile_b = _round_up(max_tile_b, 8)
        Bp = _round_up(B, tile_b)
    n_steps = Bp // tile_b

    x_p = x if Bp == B else jnp.pad(x, ((0, Bp - B), (0, 0)))

    cost = pl.CostEstimate(
        flops=2 * Bp * (n_input * Hp + Hp * Op),
        transcendentals=0,
        bytes_accessed=(x_p.size * 4 + w1_p.size * 4 + b1_p.size * 4
                        + w2_p.size * 2 + b2_p.size * 4 + Bp * Op * 4),
    )

    out_p = pl.pallas_call(
        mlp_kernel,
        out_shape=jax.ShapeDtypeStruct((Bp, Op), jnp.float32),
        grid=(n_steps,),
        in_specs=[
            pl.BlockSpec((tile_b, n_input), lambda i: (i, 0)),   # x: tiled over batch
            pl.BlockSpec((n_input, Hp), lambda i: (0, 0)),       # w1: resident
            pl.BlockSpec((1, Hp), lambda i: (0, 0)),             # b1: resident
            pl.BlockSpec((Hp, Op), lambda i: (0, 0)),            # w2: resident (bf16)
            pl.BlockSpec((1, Op), lambda i: (0, 0)),             # b2: resident
        ],
        out_specs=pl.BlockSpec((tile_b, Op), lambda i: (i, 0)),
        compiler_params=pltpu.CompilerParams(
            # Single-step grids gain nothing from megacore splitting; only
            # mark the batch axis parallel when there are multiple tiles.
            dimension_semantics=("parallel",) if n_steps > 1 else ("arbitrary",),
        ),
        cost_estimate=cost,
    )(x_p, w1_p, b1_p, w2_p, b2_p)

    # TODO(synk): downstream consumers that can read the first n_output lanes
    # of the padded output directly could skip this slice entirely.
    return out_p[:B, :n_output]


def init_params(key, n_input, n_hidden, n_output, dtype=jnp.float32):
    """Deterministic init mimicking torch.nn.Linear (U(-1/sqrt(fan_in), 1/sqrt(fan_in)))."""
    k1, k2, k3, k4 = jax.random.split(key, 4)
    bound1 = 1.0 / jnp.sqrt(n_input)
    bound2 = 1.0 / jnp.sqrt(n_hidden)
    # Stored as [in, out] (torch weight transposed) so the kernel does x @ W.
    w1 = jax.random.uniform(k1, (n_input, n_hidden), dtype, -bound1, bound1)
    b1 = jax.random.uniform(k2, (n_hidden,), dtype, -bound1, bound1)
    w2 = jax.random.uniform(k3, (n_hidden, n_output), dtype, -bound2, bound2)
    b2 = jax.random.uniform(k4, (n_output,), dtype, -bound2, bound2)
    return w1, b1, w2, b2


if __name__ == "__main__":
    key = jax.random.PRNGKey(0)
    kx0, kx1, kp = jax.random.split(key, 3)

    # Mirror the script's data: two Gaussian clusters of 100 points in 2-D.
    n_per, n_input, n_hidden, n_output = 100, 2, 32, 2
    x0 = 2.0 + jax.random.normal(kx0, (n_per, n_input), jnp.float32)
    x1 = -2.0 + jax.random.normal(kx1, (n_per, n_input), jnp.float32)
    x = jnp.concatenate([x0, x1], axis=0)          # (200, 2)

    w1, b1, w2, b2 = init_params(kp, n_input, n_hidden, n_output)

    # Pad weights ONCE (amortized over all forward calls).
    padded_params, (_, n_out) = prepare_padded_params(w1, b1, w2, b2)

    out = classification_forward(x, padded_params, n_out)
    out = jax.block_until_ready(out)

    # Reference check in plain JAX (same math as the PyTorch forward, f32).
    ref = jnp.maximum(x @ w1 + b1, 0.0) @ w2 + b2
    assert out.shape == (2 * n_per, n_output)
    # Tolerance loosened for bf16 MXU operands (f32 accumulate).
    assert jnp.allclose(out, ref, atol=5e-2, rtol=5e-2)

    print("KERNEL_OK")
</pallas_src>

<mosaic_0001>
module attributes {stable_mosaic.version = 11 : i64} {
  func.func @mlp_kernel(%arg0: i32, %arg1: memref<200x2xf32, #tpu.memory_space<vmem>>, %arg2: memref<2x128xf32, #tpu.memory_space<vmem>>, %arg3: memref<1x128xf32, #tpu.memory_space<vmem>>, %arg4: memref<128x128xbf16, #tpu.memory_space<vmem>>, %arg5: memref<1x128xf32, #tpu.memory_space<vmem>>, %arg6: memref<200x128xf32, #tpu.memory_space<vmem>>) attributes {dimension_semantics = [#tpu.dimension_semantics<arbitrary>], iteration_bounds = array<i64: 1>, scalar_prefetch = 0 : i64, scratch_operands = 0 : i64, tpu.core_type = #tpu.core_type<tc>, window_params = [{transform_indices = @transform_0, window_bounds = array<i64: 200, 2>}, {pipeline_mode = #tpu.pipeline_mode<synchronous>, transform_indices = @transform_1, window_bounds = array<i64: 2, 128>}, {pipeline_mode = #tpu.pipeline_mode<synchronous>, transform_indices = @transform_2, window_bounds = array<i64: 1, 128>}, {pipeline_mode = #tpu.pipeline_mode<synchronous>, transform_indices = @transform_3, window_bounds = array<i64: 128, 128>}, {pipeline_mode = #tpu.pipeline_mode<synchronous>, transform_indices = @transform_4, window_bounds = array<i64: 1, 128>}, {transform_indices = @transform_5, window_bounds = array<i64: 200, 128>}]} {
    %c0 = arith.constant 0 : index
    %c0_0 = arith.constant 0 : index
    %0 = vector.load %arg1[%c0, %c0_0] : memref<200x2xf32, #tpu.memory_space<vmem>>, vector<200x2xf32>
    %c0_1 = arith.constant 0 : index
    %c0_2 = arith.constant 0 : index
    %1 = vector.load %arg2[%c0_1, %c0_2] : memref<2x128xf32, #tpu.memory_space<vmem>>, vector<2x128xf32>
    %2 = vector.extract_strided_slice %0 {offsets = [0, 0], sizes = [200, 1], strides = [1, 1]} : vector<200x2xf32> to vector<200x1xf32>
    %3 = vector.extract_strided_slice %1 {offsets = [0, 0], sizes = [1, 128], strides = [1, 1]} : vector<2x128xf32> to vector<1x128xf32>
    %4 = vector.broadcast %2 : vector<200x1xf32> to vector<200x128xf32>
    %5 = vector.broadcast %3 : vector<1x128xf32> to vector<200x128xf32>
    %6 = arith.mulf %4, %5 : vector<200x128xf32>
    %7 = vector.extract_strided_slice %0 {offsets = [0, 1], sizes = [200, 1], strides = [1, 1]} : vector<200x2xf32> to vector<200x1xf32>
    %8 = vector.extract_strided_slice %1 {offsets = [1, 0], sizes = [1, 128], strides = [1, 1]} : vector<2x128xf32> to vector<1x128xf32>
    %9 = vector.broadcast %7 : vector<200x1xf32> to vector<200x128xf32>
    %10 = vector.broadcast %8 : vector<1x128xf32> to vector<200x128xf32>
    %11 = arith.mulf %9, %10 : vector<200x128xf32>
    %12 = arith.addf %6, %11 : vector<200x128xf32>
    %c0_3 = arith.constant 0 : index
    %c0_4 = arith.constant 0 : index
    %13 = vector.load %arg3[%c0_3, %c0_4] : memref<1x128xf32, #tpu.memory_space<vmem>>, vector<1x128xf32>
    %14 = vector.broadcast %13 : vector<1x128xf32> to vector<200x128xf32>
    %15 = arith.addf %12, %14 : vector<200x128xf32>
    %cst = arith.constant 0.000000e+00 : f32
    %16 = vector.broadcast %cst : f32 to vector<200x128xf32>
    %17 = arith.maximumf %15, %16 : vector<200x128xf32>
    %18 = arith.truncf %17 : vector<200x128xf32> to vector<200x128xbf16>
    %c0_5 = arith.constant 0 : index
    %c0_6 = arith.constant 0 : index
    %19 = vector.load %arg4[%c0_5, %c0_6] : memref<128x128xbf16, #tpu.memory_space<vmem>>, vector<128x128xbf16>
    %cst_7 = arith.constant dense<0.000000e+00> : vector<200x128xf32>
    %20 = tpu.matmul %18, %19, %cst_7 {dimension_numbers = #tpu.dot_dimension_numbers<[1], [0], [0], [1], [0, 0, 1, 1], [], []>} : vector<200x128xbf16>, vector<128x128xbf16>, vector<200x128xf32> -> vector<200x128xf32>
    %c0_8 = arith.constant 0 : index
    %c0_9 = arith.constant 0 : index
    %21 = vector.load %arg5[%c0_8, %c0_9] : memref<1x128xf32, #tpu.memory_space<vmem>>, vector<1x128xf32>
    %22 = vector.broadcast %21 : vector<1x128xf32> to vector<200x128xf32>
    %23 = arith.addf %20, %22 : vector<200x128xf32>
    %c0_10 = arith.constant 0 : index
    %c0_11 = arith.constant 0 : index
    %24 = vector.load %arg6[%c0_10, %c0_11] : memref<200x128xf32, #tpu.memory_space<vmem>>, vector<200x128xf32>
    tpu.vector_store %arg6[%c0_10, %c0_11], %23 {strides = array<i32>} : memref<200x128xf32, #tpu.memory_space<vmem>>, vector<200x128xf32>,
    return
  }
  func.func @transform_0(%arg0: i32) -> (i32, i32) {
    %c0_i32 = arith.constant 0 : i32
    %c0_i32_0 = arith.constant 0 : i32
    return %arg0, %c0_i32 : i32, i32
  }
  func.func @transform_1(%arg0: i32) -> (i32, i32) {
    %c0_i32 = arith.constant 0 : i32
    %c0_i32_0 = arith.constant 0 : i32
    %c0_i32_1 = arith.constant 0 : i32
    return %c0_i32, %c0_i32_0 : i32, i32
  }
  func.func @transform_2(%arg0: i32) -> (i32, i32) {
    %c0_i32 = arith.constant 0 : i32
    %c0_i32_0 = arith.constant 0 : i32
    %c0_i32_1 = arith.constant 0 : i32
    return %c0_i32, %c0_i32_0 : i32, i32
  }
  func.func @transform_3(%arg0: i32) -> (i32, i32) {
    %c0_i32 = arith.constant 0 : i32
    %c0_i32_0 = arith.constant 0 : i32
    %c0_i32_1 = arith.constant 0 : i32
    return %c0_i32, %c0_i32_0 : i32, i32
  }
  func.func @transform_4(%arg0: i32) -> (i32, i32) {
    %c0_i32 = arith.constant 0 : i32
    %c0_i32_0 = arith.constant 0 : i32
    %c0_i32_1 = arith.constant 0 : i32
    return %c0_i32, %c0_i32_0 : i32, i32
  }
  func.func @transform_5(%arg0: i32) -> (i32, i32) {
    %c0_i32 = arith.constant 0 : i32
    %c0_i32_0 = arith.constant 0 : i32
    return %arg0, %c0_i32 : i32, i32
  }
}

</mosaic_0001>

<bundles_post_ra>
// kernel: tpu_custom_call.1
= control target key start
LH: loop header
LB: loop body
LE: loop exit
PB: predicated region body
PF: predicated region fallthrough
CT: control target
= control target key end

     0   :  { %v855_v2 = vmov 1   ;;  %v856_v5 = vmov 0.0   ;;  %v857_v10 = vmov 0   ;;  %s1214_s0 = inlined_call_operand.vmem [shape: f32[200,2], index: 0, kind: input, shape index: {}]   ;;  %s1215_s1 = inlined_call_operand.vmem [shape: f32[2,128], index: 1, kind: input, shape index: {}]   ;;  %s1216_s2 = inlined_call_operand.vmem [shape: f32[1,128], index: 2, kind: input, shape index: {}]   ;;  %s1217_s3 = inlined_call_operand.vmem [shape: bf16[128,128], index: 3, kind: input, shape index: {}]   ;;  %s1218_s4 = inlined_call_operand.vmem [shape: f32[1,128], index: 4, kind: input, shape index: {}]   ;;  %s1219_s5 = inlined_call_operand.hbm [shape: f32[200,128], index: 5, kind: output, shape index: {}]  }
   0x1   :  { %v24_v0 = vld [vmem:[%s1214_s0 + $0x10] sm:$0xff]  ;;  %v22_v1 = vld [vmem:[%s1214_s0] sm:$0xff]  ;;  %798 = vset.pattern.permute.xlu0 %v855_v2  ;;  %796 = vset.pattern.permute.xlu1 %v855_v2  ;;  %v23_v4 = vld [vmem:[%s1214_s0 + $0x8] sm:$0xff] }
   0x2   :  { %211 = vperm.xlu0 %798, %v24_v0   ;;  %203 = vperm.xlu1 %796, %v22_v1   ;;  %v903_v3 = vld [vmem:[%s1214_s0 + $0x20] sm:$0xff]  ;;  %v914_v6 = vld [vmem:[%s1214_s0 + $0x30] sm:$0xff]  ;;  %v25_v7 = vld [vmem:[%s1214_s0 + $0x18] sm:$0xff] }
   0x3   :  { %705 = vmatprep.subr.bf16.mxu0 %v856_v5  ;;  %773 = vmatprep.subr.bf16.mxu1 %v856_v5  ;;  %v922_v8 = vld [vmem:[%s1214_s0 + $0x40] sm:$0xff]  ;;  %v824_v11 = vld [vmem:[%s1217_s3 + $0x8] sm:$0xff]   ;;  %v938_v12 = vld [vmem:[%s1214_s0 + $0x50] sm:$0xff] }
   0x4   :  { %v823_v9 = vld [vmem:[%s1217_s3] sm:$0xff]   ;;  %v825_v13 = vld [vmem:[%s1217_s3 + $0x10] sm:$0xff]  }
   0x5   :  { %706 = vmatpush3.bf16.msra.mxu0 %v823_v9  ;;  %781 = vmatpush3.bf16.msra.mxu1 %v823_v9 }
   0x6   :  { %219 = vperm.xlu0 %798, %v903_v3   ;;  %207 = vperm.xlu1 %796, %v23_v4  }
   0x7   :  { %707 = vmatprep.subr.bf16.mxu0 %v856_v5  ;;  %774 = vmatprep.subr.bf16.mxu1 %v856_v5 }
   0x9   :  { %708 = vmatpush3.bf16.msra.mxu0 %v824_v11 }
   0xa   :  { %227 = vperm.xlu0 %798, %v914_v6   ;;  %797 = vset.pattern.permute.xlu1 %v857_v10 }
   0xb   :  { %65 = vperm.xlu1 %797, %v25_v7  }
   0xe   :  { %235 = vperm.xlu0 %798, %v922_v8  }
   0xf   :  { %799 = vset.pattern.permute.xlu1 %v855_v2 }
  0x10   :  { %10 = vsyncpa [#allocation3], 0  ;;  %215 = vperm.xlu1 %799, %v25_v7   ;;  %709 = vmatprep.subr.bf16.mxu0 %v856_v5  ;;  %v36_v14 = vld [vmem:[%s1214_s0 + $0x70] sm:$0xff]  ;;  %v826_v15 = vld [vmem:[%s1217_s3 + $0x18] sm:$0xff]   ;;  %vm858_vm0 = vmmov 0   ;;  %v173_v40 = vlaneseq }
  0x11   :  { %782 = vmatpush3.bf16.msra.mxu1 %v824_v11  ;;  %710 = vmatpush3.bf16.msra.mxu0 %v825_v13  ;;  %v827_v16 = vld [vmem:[%s1217_s3 + $0x20] sm:$0xff]   ;;  %v37_v17 = vld [vmem:[%s1214_s0 + $0x78] sm:$0xff]  ;;  %v828_v18 = vld [vmem:[%s1217_s3 + $0x28] sm:$0xff]  }
  0x12   :  { %243 = vperm.xlu0 %798, %v938_v12   ;;  %775 = vmatprep.subr.bf16.mxu1 %v856_v5  ;;  %v27_v19 = vld [vmem:[%s1214_s0 + $0x28] sm:$0xff]  ;;  %v829_v20 = vld [vmem:[%s1217_s3 + $0x30] sm:$0xff]   ;;  %v830_v21 = vld [vmem:[%s1217_s3 + $0x38] sm:$0xff]   ;;  %v174_v43 = vshrl.u32 %v173_v40, 7 }
  0x13   :  { %711 = vmatprep.subr.bf16.mxu0 %v856_v5  ;;  %721 = vmatprep.mubr.msk.bf16.mxu0 %vm858_vm0, %v856_v5  ;;  %v39_v22 = vld [vmem:[%s1214_s0 + $0x88] sm:$0xff]  ;;  %v38_v23 = vld [vmem:[%s1214_s0 + $0x80] sm:$0xff]  ;;  %v41_v24 = vld [vmem:[%s1214_s0 + $0x98] sm:$0xff] }
  0x14   :  { %800 = vset.pattern.permute.xlu1 %v857_v10  ;;  %749 = vmatprep.mubr.msk.bf16.mxu1 %vm858_vm0, %v856_v5  ;;  %v43_v25 = vld [vmem:[%s1214_s0 + $0xa8] sm:$0xff]  ;;  %v29_v26 = vld [vmem:[%s1214_s0 + $0x38] sm:$0xff]  ;;  %v40_v28 = vld [vmem:[%s1214_s0 + $0x90] sm:$0xff]  ;;  %v304_v45 = vsub.s32 1, %v174_v43  ;;  %v175_v48 = vsub.s32 0, %v174_v43 }
  0x15   :  { %120 = vperm.xlu1 %800, %v36_v14   ;;  %783 = vmatpush3.bf16.msra.mxu1 %v825_v13  ;;  %v45_v27 = vld [vmem:[%s1214_s0 + $0xb8] sm:$0xff]  ;;  %v34_v29 = vld [vmem:[%s1214_s0 + $0x60] sm:$0xff]  ;;  %v31_v31 = vld [vmem:[%s1214_s0 + $0x48] sm:$0xff] }
  0x16   :  { %815 = vset.pattern.permute.xlu0 %v857_v10  ;;  %776 = vmatprep.subr.bf16.mxu1 %v856_v5  ;;  %v46_v30 = vld [vmem:[%s1214_s0 + $0xc0] sm:$0xff]  ;;  %v33_v33 = vld [vmem:[%s1214_s0 + $0x58] sm:$0xff]  ;;  %v44_v34 = vld [vmem:[%s1214_s0 + $0xb0] sm:$0xff] }
  0x17   :  { %50 = vperm.xlu0 %815, %v22_v1   ;;  %712 = vmatpush3.bf16.msra.mxu0 %v826_v15  ;;  %v42_v32 = vld [vmem:[%s1214_s0 + $0xa0] sm:$0xff]  ;;  %v35_v35 = vld [vmem:[%s1214_s0 + $0x68] sm:$0xff] }
  0x18   :  { %713 = vmatprep.subr.bf16.mxu0 %v856_v5  ;;  %v47_v47 = vld [vmem:[%s1215_s1] sm:$0x3] }
  0x19   :  { %801 = vset.pattern.permute.xlu1 %v855_v2  ;;  %784 = vmatpush3.bf16.msra.mxu1 %v826_v15  ;;  %v1063_v50 = vrot.slane %v47_v47, %v304_v45  ;;  %v1065_v52 = vrot.slane %v47_v47, %v175_v48  ;;  %v1074_v61 = vld [vmem:[%s1216_s2] ss:$0 sm:$0xff] }
  0x1a   :  { %259 = vperm.xlu1 %801, %v36_v14   ;;  %777 = vmatprep.subr.bf16.mxu1 %v856_v5 }
  0x1b   :  { %55 = vperm.xlu0 %815, %v23_v4   ;;  %714 = vmatpush3.bf16.msra.mxu0 %v827_v16 }
  0x1c   :  { %715 = vmatprep.subr.bf16.mxu0 %v856_v5 }
  0x1d   :  { %785 = vmatpush3.bf16.msra.mxu1 %v827_v16 }
  0x1e   :  { %263 = vperm.xlu1 %801, %v37_v17   ;;  %778 = vmatprep.subr.bf16.mxu1 %v856_v5 }
  0x1f   :  { %60 = vperm.xlu0 %815, %v24_v0   ;;  %716 = vmatpush3.bf16.msra.mxu0 %v828_v18 }
  0x20   :  { %717 = vmatprep.subr.bf16.mxu0 %v856_v5 }
  0x21   :  { %786 = vmatpush3.bf16.msra.mxu1 %v828_v18 }
  0x22   :  { %802 = vset.pattern.permute.xlu1 %v857_v10  ;;  %779 = vmatprep.subr.bf16.mxu1 %v856_v5 }
  0x23   :  { %125 = vperm.xlu0 %815, %v37_v17   ;;  %75 = vperm.xlu1 %802, %v27_v19  }
  0x24   :  { %718 = vmatpush3.bf16.msra.mxu0 %v829_v20 }
  0x25   :  { %719 = vmatprep.subr.bf16.mxu0 %v856_v5  ;;  %787 = vmatpush3.bf16.msra.mxu1 %v829_v20 }
  0x26   :  { %780 = vmatprep.subr.bf16.mxu1 %v856_v5 }
  0x27   :  { %70 = vperm.xlu0 %815, %v903_v3   ;;  %803 = vset.pattern.permute.xlu1 %v855_v2 }
  0x28   :  { %223 = vperm.xlu1 %803, %v27_v19   ;;  %720 = vmatpush3.bf16.msra.mxu0 %v830_v21 }
  0x29   :  { %788 = vmatpush3.bf16.msra.mxu1 %v830_v21 }
  0x2b   :  { %135 = vperm.xlu0 %815, %v39_v22  }
  0x2c   :  { %804 = vset.pattern.permute.xlu1 %v857_v10 }
  0x2d   :  { %130 = vperm.xlu1 %804, %v38_v23  }
  0x2f   :  { %80 = vperm.xlu0 %815, %v914_v6  }
  0x31   :  { %805 = vset.pattern.permute.xlu1 %v855_v2 }
  0x32   :  { %267 = vperm.xlu1 %805, %v38_v23  }
  0x33   :  { %145 = vperm.xlu0 %815, %v41_v24  }
  0x36   :  { %271 = vperm.xlu1 %805, %v39_v22  }
  0x37   :  { %90 = vperm.xlu0 %815, %v922_v8  }
  0x3a   :  { %806 = vset.pattern.permute.xlu1 %v857_v10 }
  0x3b   :  { %155 = vperm.xlu0 %815, %v43_v25   ;;  %85 = vperm.xlu1 %806, %v29_v26  }
  0x3f   :  { %100 = vperm.xlu0 %815, %v938_v12   ;;  %807 = vset.pattern.permute.xlu1 %v855_v2 }
  0x40   :  { %231 = vperm.xlu1 %807, %v29_v26  }
  0x43   :  { %165 = vperm.xlu0 %815, %v45_v27  }
  0x44   :  { %808 = vset.pattern.permute.xlu1 %v857_v10 }
  0x45   :  { %140 = vperm.xlu1 %808, %v40_v28  }
  0x47   :  { %110 = vperm.xlu0 %815, %v34_v29  }
  0x49   :  { %809 = vset.pattern.permute.xlu1 %v855_v2 }
  0x4a   :  { %275 = vperm.xlu1 %809, %v40_v28  }
  0x4b   :  { %820 = vset.pattern.permute.xlu0 %v855_v2 }
  0x4c   :  { %251 = vperm.xlu0 %820, %v34_v29  }
  0x4e   :  { %279 = vperm.xlu1 %809, %v41_v24  }
  0x50   :  { %299 = vperm.xlu0 %820, %v46_v30  }
  0x52   :  { %810 = vset.pattern.permute.xlu1 %v857_v10 }
  0x53   :  { %95 = vperm.xlu1 %810, %v31_v31  }
  0x57   :  { %811 = vset.pattern.permute.xlu1 %v855_v2 }
  0x58   :  { %239 = vperm.xlu1 %811, %v31_v31  }
  0x5c   :  { %812 = vset.pattern.permute.xlu1 %v857_v10 }
  0x5d   :  { %150 = vperm.xlu1 %812, %v42_v32  }
  0x61   :  { %813 = vset.pattern.permute.xlu1 %v855_v2 }
  0x62   :  { %283 = vperm.xlu1 %813, %v42_v32  }
  0x66   :  { %287 = vperm.xlu1 %813, %v43_v25  }
  0x6a   :  { %814 = vset.pattern.permute.xlu1 %v857_v10 }
  0x6b   :  { %105 = vperm.xlu1 %814, %v33_v33  }
  0x6f   :  { %816 = vset.pattern.permute.xlu1 %v855_v2 }
  0x70   :  { %247 = vperm.xlu1 %816, %v33_v33  }
  0x74   :  { %817 = vset.pattern.permute.xlu1 %v857_v10 }
  0x75   :  { %160 = vperm.xlu1 %817, %v44_v34  }
  0x79   :  { %818 = vset.pattern.permute.xlu1 %v855_v2 }
  0x7a   :  { %291 = vperm.xlu1 %818, %v44_v34  }
  0x7e   :  { %295 = vperm.xlu1 %818, %v45_v27  }
  0x81   :  { %v204_v36 = vpop.permute.xlu1 %203  ;;  %v212_v37 = vpop.permute.xlu0 %211 }
  0x82   :  { %819 = vset.pattern.permute.xlu1 %v857_v10  ;;  %v306_v54 = vmul.f32 %v1063_v50, %v204_v36  ;;  %v308_v63 = vmul.f32 %v1063_v50, %v212_v37 }
  0x83   :  { %115 = vperm.xlu1 %819, %v35_v35  }
  0x85   :  { %v208_v38 = vpop.permute.xlu1 %207  ;;  %v220_v39 = vpop.permute.xlu0 %219 }
  0x86   :  { %v307_v59 = vmul.f32 %v1063_v50, %v208_v38  ;;  %v310_v21 = vmul.f32 %v1063_v50, %v220_v39 }
  0x87   :  { %821 = vset.pattern.permute.xlu1 %v855_v2 }
  0x88   :  { %255 = vperm.xlu1 %821, %v35_v35  }
  0x89   :  { %v1053_v41 = vpop.permute.xlu0 %227 }
  0x8a   :  { %v66_v42 = vpop.permute.xlu1 %65 }
  0x8b   :  { %v180_v4 = vmul.f32 %v1065_v52, %v66_v42 }
  0x8c   :  { %822 = vset.pattern.permute.xlu1 %v857_v10 }
  0x8d   :  { %170 = vperm.xlu1 %822, %v46_v30   ;;  %v1056_v44 = vpop.permute.xlu0 %235 }
  0x8f   :  { %v216_v46 = vpop.permute.xlu1 %215 }
  0x90   :  { %v309_v62 = vmul.f32 %v1063_v50, %v216_v46 }
  0x91   :  { %v1061_v49 = vpop.permute.xlu0 %243 }
  0x92   :  { %v334_v10 = vadd.f32 %v309_v62, %v180_v4 }
  0x94   :  { %v121_v51 = vpop.permute.xlu1 %120  ;;  %v366_v22 = vadd.f32 %v1074_v61, %v334_v10 }
  0x95   :  { %v191_v7 = vmul.f32 %v1065_v52, %v121_v51 }
  0x96   :  { %v51_v53 = vpop.permute.xlu0 %50  ;;  %v391_v32 = vmax.f32 %v366_v22, 0.0 }
  0x97   :  { %v177_v55 = vmul.f32 %v1065_v52, %v51_v53 }
  0x99   :  { %v331_v56 = vadd.f32 %v306_v54, %v177_v55  ;;  %v260_v57 = vpop.permute.xlu1 %259 }
  0x9a   :  { %v56_v58 = vpop.permute.xlu0 %55  ;;  %v320_v1 = vmul.f32 %v1063_v50, %v260_v57 }
  0x9b   :  { %v178_v60 = vmul.f32 %v1065_v52, %v56_v58  ;;  %v363_v0 = vadd.f32 %v1074_v61, %v331_v56 }
  0x9c   :  { %v345_v12 = vadd.f32 %v320_v1, %v191_v7 }
  0x9d   :  { %v332_v2 = vadd.f32 %v307_v59, %v178_v60  ;;  %v264_v3 = vpop.permute.xlu1 %263  ;;  %v388_v11 = vmax.f32 %v363_v0, 0.0  ;;  %v312_v59 = vmul.f32 %v1063_v50, %v1053_v41 }
  0x9e   :  { %v61_v6 = vpop.permute.xlu0 %60  ;;  %v321_v17 = vmul.f32 %v1063_v50, %v264_v3  ;;  %v377_v23 = vadd.f32 %v1074_v61, %v345_v12 }
  0x9f   :  { %v364_v8 = vadd.f32 %v1074_v61, %v332_v2  ;;  %v179_v9 = vmul.f32 %v1065_v52, %v61_v6 }
  0xa0   :  { %v402_v33 = vmax.f32 %v377_v23, 0.0 }
  0xa1   :  { %v389_v13 = vmax.f32 %v364_v8, 0.0  ;;  %v333_v14 = vadd.f32 %v308_v63, %v179_v9 }
  0xa2   :  { %v126_v15 = vpop.permute.xlu0 %125  ;;  %v76_v16 = vpop.permute.xlu1 %75 }
  0xa3   :  { %v365_v18 = vadd.f32 %v1074_v61, %v333_v14  ;;  %v192_v19 = vmul.f32 %v1065_v52, %v126_v15  ;;  %v413_v20 = vpack.c.bf16 %v389_v13, %v388_v11  ;;  %v182_v30 = vmul.f32 %v1065_v52, %v76_v16 }
  0xa5   :  { %v346_v24 = vadd.f32 %v321_v17, %v192_v19  ;;  %722 = vmatmul.mubr.bf16.vlgmr.msra.gmra.mrb[0].mxu0 %v413_v20  ;;  %v390_v26 = vmax.f32 %v365_v18, 0.0 }
  0xa6   :  { %v71_v25 = vpop.permute.xlu0 %70  ;;  %725 = vmatprep.mubr.msk.bf16.mxu0 %vm858_vm0, %v856_v5 }
  0xa7   :  { %v378_v27 = vadd.f32 %v1074_v61, %v346_v24  ;;  %v181_v28 = vmul.f32 %v1065_v52, %v71_v25  ;;  %v224_v29 = vpop.permute.xlu1 %223  ;;  %v414_v38 = vpack.c.bf16 %v391_v32, %v390_v26 }
  0xa8   :  { %v311_v31 = vmul.f32 %v1063_v50, %v224_v29 }
  0xa9   :  { %v403_v34 = vmax.f32 %v378_v27, 0.0  ;;  %v335_v35 = vadd.f32 %v310_v21, %v181_v28  ;;  %v314_v27 = vmul.f32 %v1063_v50, %v1056_v44 }
  0xaa   :  { %v336_v36 = vadd.f32 %v311_v31, %v182_v30  ;;  %v136_v46 = vpop.permute.xlu0 %135 }
  0xab   :  { %v367_v37 = vadd.f32 %v1074_v61, %v335_v35  ;;  %v420_v39 = vpack.c.bf16 %v403_v34, %v402_v33  ;;  %v194_v54 = vmul.f32 %v1065_v52, %v136_v46 }
  0xac   :  { %v368_v40 = vadd.f32 %v1074_v61, %v336_v36  ;;  %v131_v42 = vpop.permute.xlu1 %130 }
  0xad   :  { %726 = vmatmul.mubr.bf16.gmra.mrb[4].mxu0 %v414_v38  ;;  %750 = vmatmul.mubr.bf16.vlgmr.msra.gmra.mrb[0].mxu1 %v420_v39  ;;  %v392_v43 = vmax.f32 %v367_v37, 0.0  ;;  %v193_v48 = vmul.f32 %v1065_v52, %v131_v42 }
  0xae   :  { %729 = vmatprep.mubr.msk.bf16.mxu0 %vm858_vm0, %v856_v5  ;;  %753 = vmatprep.mubr.msk.bf16.mxu1 %vm858_vm0, %v856_v5  ;;  %v393_v45 = vmax.f32 %v368_v40, 0.0  ;;  %v81_v58 = vpop.permute.xlu0 %80 }
  0xaf   :  { %v183_v60 = vmul.f32 %v1065_v52, %v81_v58 }
  0xb0   :  { %v415_v53 = vpack.c.bf16 %v393_v45, %v392_v43 }
  0xb1   :  { %v268_v47 = vpop.permute.xlu1 %267  ;;  %v337_v2 = vadd.f32 %v312_v59, %v183_v60  ;;  %v316_v60 = vmul.f32 %v1063_v50, %v1061_v49 }
  0xb2   :  { %v322_v51 = vmul.f32 %v1063_v50, %v268_v47  ;;  %v146_v19 = vpop.permute.xlu0 %145 }
  0xb3   :  { %v369_v8 = vadd.f32 %v1074_v61, %v337_v2  ;;  %v196_v20 = vmul.f32 %v1065_v52, %v146_v19 }
  0xb4   :  { %v347_v55 = vadd.f32 %v322_v51, %v193_v48 }
  0xb5   :  { %730 = vmatmul.mubr.bf16.gmra.mrb[8].mxu0 %v415_v53  ;;  %v272_v56 = vpop.permute.xlu1 %271  ;;  %v394_v11 = vmax.f32 %v369_v8, 0.0 }
  0xb6   :  { %v323_v57 = vmul.f32 %v1063_v50, %v272_v56  ;;  %733 = vmatprep.mubr.msk.bf16.mxu0 %vm858_vm0, %v856_v5  ;;  %v379_v62 = vadd.f32 %v1074_v61, %v347_v55  ;;  %v91_v26 = vpop.permute.xlu0 %90 }
  0xb7   :  { %v185_v28 = vmul.f32 %v1065_v52, %v91_v26 }
  0xb8   :  { %v348_v63 = vadd.f32 %v323_v57, %v194_v54  ;;  %v404_v3 = vmax.f32 %v379_v62, 0.0 }
  0xb9   :  { %v339_v33 = vadd.f32 %v314_v27, %v185_v28 }
  0xba   :  { %v380_v0 = vadd.f32 %v1074_v61, %v348_v63  ;;  %v86_v1 = vpop.permute.xlu1 %85  ;;  %v156_v46 = vpop.permute.xlu0 %155 }
  0xbb   :  { %v184_v9 = vmul.f32 %v1065_v52, %v86_v1  ;;  %v371_v44 = vadd.f32 %v1074_v61, %v339_v33  ;;  %v198_v55 = vmul.f32 %v1065_v52, %v156_v46 }
  0xbc   :  { %v405_v4 = vmax.f32 %v380_v0, 0.0 }
  0xbd   :  { %v396_v42 = vmax.f32 %v371_v44, 0.0 }
  0xbe   :  { %v421_v6 = vpack.c.bf16 %v405_v4, %v404_v3  ;;  %v101_v57 = vpop.permute.xlu0 %100 }
  0xbf   :  { %v232_v7 = vpop.permute.xlu1 %231  ;;  %v187_v62 = vmul.f32 %v1065_v52, %v101_v57 }
  0xc0   :  { %v313_v10 = vmul.f32 %v1063_v50, %v232_v7  ;;  %754 = vmatmul.mubr.bf16.gmra.mrb[4].mxu1 %v421_v6 }
  0xc1   :  { %757 = vmatprep.mubr.msk.bf16.mxu1 %vm858_vm0, %v856_v5  ;;  %v341_v3 = vadd.f32 %v316_v60, %v187_v62 }
  0xc2   :  { %v338_v41 = vadd.f32 %v313_v10, %v184_v9  ;;  %v166_v10 = vpop.permute.xlu0 %165 }
  0xc3   :  { %v373_v49 = vadd.f32 %v1074_v61, %v341_v3 }
  0xc4   :  { %v370_v12 = vadd.f32 %v1074_v61, %v338_v41  ;;  %v141_v13 = vpop.permute.xlu1 %140 }
  0xc5   :  { %v195_v17 = vmul.f32 %v1065_v52, %v141_v13 }
  0xc6   :  { %v395_v14 = vmax.f32 %v370_v12, 0.0  ;;  %v398_v12 = vmax.f32 %v373_v49, 0.0 }
  0xc8   :  { %v416_v15 = vpack.c.bf16 %v395_v14, %v394_v11 }
  0xc9   :  { %v276_v16 = vpop.permute.xlu1 %275 }
  0xca   :  { %v324_v18 = vmul.f32 %v1063_v50, %v276_v16  ;;  %734 = vmatmul.mubr.bf16.gmra.mrb[12].mxu0 %v416_v15  ;;  %v111_v15 = vpop.permute.xlu0 %110 }
  0xcb   :  { %737 = vmatprep.mubr.msk.bf16.mxu0 %vm858_vm0, %v856_v5  ;;  %v189_v26 = vmul.f32 %v1065_v52, %v111_v15 }
  0xcc   :  { %v349_v21 = vadd.f32 %v324_v18, %v195_v17 }
  0xcd   :  { %v280_v22 = vpop.permute.xlu1 %279 }
  0xce   :  { %v325_v23 = vmul.f32 %v1063_v50, %v280_v22  ;;  %v381_v24 = vadd.f32 %v1074_v61, %v349_v21  ;;  %v200_v21 = vmul.f32 %v1065_v52, %v166_v10 }
  0xd0   :  { %v350_v25 = vadd.f32 %v325_v23, %v196_v20  ;;  %v406_v31 = vmax.f32 %v381_v24, 0.0  ;;  %v252_v23 = vpop.permute.xlu0 %251 }
  0xd1   :  { %v318_v27 = vmul.f32 %v1063_v50, %v252_v23 }
  0xd2   :  { %v382_v29 = vadd.f32 %v1074_v61, %v350_v25  ;;  %v96_v30 = vpop.permute.xlu1 %95 }
  0xd3   :  { %v186_v36 = vmul.f32 %v1065_v52, %v96_v30 }
  0xd4   :  { %v407_v32 = vmax.f32 %v382_v29, 0.0 }
  0xd6   :  { %v422_v34 = vpack.c.bf16 %v407_v32, %v406_v31  ;;  %v343_v32 = vadd.f32 %v318_v27, %v189_v26 }
  0xd7   :  { %v240_v35 = vpop.permute.xlu1 %239 }
  0xd8   :  { %v315_v37 = vmul.f32 %v1063_v50, %v240_v35  ;;  %758 = vmatmul.mubr.bf16.gmra.mrb[8].mxu1 %v422_v34 }
  0xd9   :  { %761 = vmatprep.mubr.msk.bf16.mxu1 %vm858_vm0, %v856_v5 }
  0xda   :  { %v340_v38 = vadd.f32 %v315_v37, %v186_v36  ;;  %v375_v37 = vadd.f32 %v1074_v61, %v343_v32 }
  0xdc   :  { %v372_v39 = vadd.f32 %v1074_v61, %v340_v38  ;;  %v151_v40 = vpop.permute.xlu1 %150  ;;  %v300_v38 = vpop.permute.xlu0 %299 }
  0xdd   :  { %v197_v48 = vmul.f32 %v1065_v52, %v151_v40 }
  0xde   :  { %v397_v43 = vmax.f32 %v372_v39, 0.0 }
  0xe0   :  { %v417_v45 = vpack.c.bf16 %v397_v43, %v396_v42  ;;  %v330_v42 = vmul.f32 %v1063_v50, %v300_v38 }
  0xe1   :  { %v284_v47 = vpop.permute.xlu1 %283 }
  0xe2   :  { %v326_v51 = vmul.f32 %v1063_v50, %v284_v47  ;;  %738 = vmatmul.mubr.bf16.gmra.mrb[16].mxu0 %v417_v45  ;;  %v400_v45 = vmax.f32 %v375_v37, 0.0 }
  0xe3   :  { %741 = vmatprep.mubr.msk.bf16.mxu0 %vm858_vm0, %v856_v5 }
  0xe4   :  { %v351_v53 = vadd.f32 %v326_v51, %v197_v48 }
  0xe5   :  { %v288_v54 = vpop.permute.xlu1 %287 }
  0xe6   :  { %v327_v56 = vmul.f32 %v1063_v50, %v288_v54  ;;  %v383_v58 = vadd.f32 %v1074_v61, %v351_v53  ;;  %v1175_v54 = vld [vmem:[%s1218_s4] ss:$0 sm:$0xff]  ;;  %s859_s4 = smov [#allocation2]  }
  0xe7   :  { %s663_s10 = sshll.u32 %s859_s4, 4  ;;  %s664_s10 = int_to_ptr.vmem [resolvable:$true] %s663_s10 }
  0xe8   :  { %v352_v59 = vadd.f32 %v327_v56, %v198_v55  ;;  %v408_v1 = vmax.f32 %v383_v58, 0.0  ;;  %s831_s11 = scalar_lea.vmem %s664_s10, 3200  ;;  %p836_p1 = scmp.lt.s32.totalorder %s664_s10, %s664_s10 }
  0xe9   :  { %p832_p0 = scmp.ne.s32.totalorder %s664_s10, %s831_s11  ;;  %p837_p2 = scmp.lt.s32.totalorder %s831_s11, %s831_s11 }
  0xea   :  { %v384_v63 = vadd.f32 %v1074_v61, %v352_v59  ;;  %v106_v0 = vpop.permute.xlu1 %105 }
  0xeb   :  { %v188_v7 = vmul.f32 %v1065_v52, %v106_v0  ;;  %p838_p3 = por %p837_p2, %p836_p1 }
  0xec   :  { %v409_v2 = vmax.f32 %v384_v63, 0.0 }
  0xed   :  { %p839_p4 = pnand %p838_p3, %p832_p0 }
  0xee   :  { %v423_v4 = vpack.c.bf16 %v409_v2, %v408_v1 }
  0xef   :  { %v248_v6 = vpop.permute.xlu1 %247 }
  0xf0   :  { %v317_v8 = vmul.f32 %v1063_v50, %v248_v6  ;;  %762 = vmatmul.mubr.bf16.gmra.mrb[12].mxu1 %v423_v4 }
  0xf1   :  { %765 = vmatprep.mubr.msk.bf16.mxu1 %vm858_vm0, %v856_v5 }
  0xf2   :  { %v342_v9 = vadd.f32 %v317_v8, %v188_v7 }
  0xf4   :  { %v374_v41 = vadd.f32 %v1074_v61, %v342_v9  ;;  %v161_v11 = vpop.permute.xlu1 %160 }
  0xf5   :  { %v199_v17 = vmul.f32 %v1065_v52, %v161_v11 }
  0xf6   :  { %v399_v13 = vmax.f32 %v374_v41, 0.0 }
  0xf8   :  { %v418_v14 = vpack.c.bf16 %v399_v13, %v398_v12 }
  0xf9   :  { %v292_v16 = vpop.permute.xlu1 %291 }
  0xfa   :  { %v328_v18 = vmul.f32 %v1063_v50, %v292_v16  ;;  %742 = vmatmul.mubr.bf16.gmra.mrb[20].mxu0 %v418_v14 }
  0xfb   :  { %745 = vmatprep.mubr.msk.bf16.mxu0 %vm858_vm0, %v856_v5 }
  0xfc   :  { %v353_v19 = vadd.f32 %v328_v18, %v199_v17 }
  0xfd   :  { %v296_v20 = vpop.permute.xlu1 %295 }
  0xfe   :  { %v329_v22 = vmul.f32 %v1063_v50, %v296_v20  ;;  %v385_v24 = vadd.f32 %v1074_v61, %v353_v19 }
 0x100   :  { %v354_v25 = vadd.f32 %v329_v22, %v200_v21  ;;  %v410_v30 = vmax.f32 %v385_v24, 0.0 }
 0x102   :  { %v386_v28 = vadd.f32 %v1074_v61, %v354_v25  ;;  %v116_v29 = vpop.permute.xlu1 %115 }
 0x103   :  { %v190_v35 = vmul.f32 %v1065_v52, %v116_v29 }
 0x104   :  { %v411_v31 = vmax.f32 %v386_v28, 0.0 }
 0x106   :  { %v424_v33 = vpack.c.bf16 %v411_v31, %v410_v30 }
 0x107   :  { %v256_v34 = vpop.permute.xlu1 %255 }
 0x108   :  { %v319_v36 = vmul.f32 %v1063_v50, %v256_v34  ;;  %766 = vmatmul.mubr.bf16.gmra.mrb[16].mxu1 %v424_v33 }
 0x109   :  { %769 = vmatprep.mubr.msk.bf16.mxu1 %vm858_vm0, %v856_v5 }
 0x10a   :  { %v344_v44 = vadd.f32 %v319_v36, %v190_v35 }
 0x10c   :  { %v376_v39 = vadd.f32 %v1074_v61, %v344_v44  ;;  %v171_v40 = vpop.permute.xlu1 %170 }
 0x10d   :  { %v201_v43 = vmul.f32 %v1065_v52, %v171_v40 }
 0x10e   :  { %v401_v46 = vmax.f32 %v376_v39, 0.0 }
 0x10f   :  { %v355_v47 = vadd.f32 %v330_v42, %v201_v43 }
 0x110   :  { %v419_v48 = vpack.c.bf16 %v401_v46, %v400_v45 }
 0x111   :  { %v387_v51 = vadd.f32 %v1074_v61, %v355_v47 }
 0x112   :  { %746 = vmatmul.mubr.bf16.gmra.mrb[24].mxu0 %v419_v48 }
 0x113   :  { %v412_v53 = vmax.f32 %v387_v51, 0.0 }
 0x115   :  { %v425_v5 = vpack.c.bf16 %v412_v53, %v412_v53 }
 0x117   :  { %770 = vmatmul.mubr.bf16.gmra.mrb[20].mxu1 %v425_v5 }
 0x178   :  { %v531_v55 = vpop.f32.mrb[0].mxu0 }
 0x179   :  { %v532_v50 = vadd.f32 %v1175_v54, %v531_v55  ;;  %v723_v56 = vpop.f32.mrb[1].mxu0 }
 0x17a   :  { %v534_v52 = vpop.f32.mrb[2].mxu0 }
 0x17b   :  { %633 = vst [vmem:[#allocation2] sm:$0xff] %v532_v50  ;;  %v535_v57 = vadd.f32 %v1175_v54, %v534_v52  ;;  %v724_v58 = vpop.f32.mrb[3].mxu0 }
 0x17d   :  { %634 = vst [vmem:[#allocation2 + $0x8] sm:$0xff] %v535_v57 }
 0x180   :  { %v539_v61 = vpop.f32.mrb[4].mxu0  ;;  %v587_v59 = vpop.f32.mrb[0].mxu1 }
 0x181   :  { %v540_v60 = vadd.f32 %v1175_v54, %v539_v61  ;;  %v588_v62 = vadd.f32 %v1175_v54, %v587_v59  ;;  %v727_v63 = vpop.f32.mrb[5].mxu0  ;;  %v751_v0 = vpop.f32.mrb[1].mxu1 }
 0x182   :  { %v542_v1 = vpop.f32.mrb[6].mxu0  ;;  %v590_v2 = vpop.f32.mrb[2].mxu1 }
 0x183   :  { %635 = vst [vmem:[#allocation2 + $0x10] sm:$0xff] %v540_v60  ;;  %647 = vst [vmem:[#allocation2 + $0x70] sm:$0xff] %v588_v62  ;;  %v543_v3 = vadd.f32 %v1175_v54, %v542_v1  ;;  %v591_v4 = vadd.f32 %v1175_v54, %v590_v2  ;;  %v728_v6 = vpop.f32.mrb[7].mxu0  ;;  %v752_v7 = vpop.f32.mrb[3].mxu1 }
 0x185   :  { %636 = vst [vmem:[#allocation2 + $0x18] sm:$0xff] %v543_v3  ;;  %648 = vst [vmem:[#allocation2 + $0x78] sm:$0xff] %v591_v4 }
 0x188   :  { %v547_v8 = vpop.f32.mrb[8].mxu0 }
 0x189   :  { %v548_v49 = vadd.f32 %v1175_v54, %v547_v8  ;;  %v731_v9 = vpop.f32.mrb[9].mxu0 }
 0x18a   :  { %v550_v10 = vpop.f32.mrb[10].mxu0 }
 0x18b   :  { %637 = vst [vmem:[#allocation2 + $0x20] sm:$0xff] %v548_v49  ;;  %v551_v41 = vadd.f32 %v1175_v54, %v550_v10  ;;  %v732_v11 = vpop.f32.mrb[11].mxu0 }
 0x18d   :  { %638 = vst [vmem:[#allocation2 + $0x28] sm:$0xff] %v551_v41 }
 0x193   :  { %v595_v12 = vpop.f32.mrb[4].mxu1 }
 0x194   :  { %v596_v13 = vadd.f32 %v1175_v54, %v595_v12  ;;  %v755_v14 = vpop.f32.mrb[5].mxu1 }
 0x195   :  { %v598_v15 = vpop.f32.mrb[6].mxu1 }
 0x196   :  { %649 = vst [vmem:[#allocation2 + $0x80] sm:$0xff] %v596_v13  ;;  %v599_v16 = vadd.f32 %v1175_v54, %v598_v15  ;;  %v756_v17 = vpop.f32.mrb[7].mxu1 }
 0x198   :  { %650 = vst [vmem:[#allocation2 + $0x88] sm:$0xff] %v599_v16 }
 0x19d   :  { %v555_v18 = vpop.f32.mrb[12].mxu0 }
 0x19e   :  { %v556_v19 = vadd.f32 %v1175_v54, %v555_v18  ;;  %v735_v20 = vpop.f32.mrb[13].mxu0 }
 0x19f   :  { %v558_v21 = vpop.f32.mrb[14].mxu0 }
 0x1a0   :  { %639 = vst [vmem:[#allocation2 + $0x30] sm:$0xff] %v556_v19  ;;  %v559_v22 = vadd.f32 %v1175_v54, %v558_v21  ;;  %v736_v23 = vpop.f32.mrb[15].mxu0 }
 0x1a2   :  { %640 = vst [vmem:[#allocation2 + $0x38] sm:$0xff] %v559_v22 }
 0x1ab   :  { %v603_v24 = vpop.f32.mrb[8].mxu1 }
 0x1ac   :  { %v604_v25 = vadd.f32 %v1175_v54, %v603_v24  ;;  %v759_v26 = vpop.f32.mrb[9].mxu1 }
 0x1ad   :  { %v606_v27 = vpop.f32.mrb[10].mxu1 }
 0x1ae   :  { %651 = vst [vmem:[#allocation2 + $0x90] sm:$0xff] %v604_v25  ;;  %v607_v28 = vadd.f32 %v1175_v54, %v606_v27  ;;  %v760_v29 = vpop.f32.mrb[11].mxu1 }
 0x1b0   :  { %652 = vst [vmem:[#allocation2 + $0x98] sm:$0xff] %v607_v28 }
 0x1b5   :  { %v563_v30 = vpop.f32.mrb[16].mxu0 }
 0x1b6   :  { %v564_v31 = vadd.f32 %v1175_v54, %v563_v30  ;;  %v739_v32 = vpop.f32.mrb[17].mxu0 }
 0x1b7   :  { %v566_v33 = vpop.f32.mrb[18].mxu0 }
 0x1b8   :  { %641 = vst [vmem:[#allocation2 + $0x40] sm:$0xff] %v564_v31  ;;  %v567_v34 = vadd.f32 %v1175_v54, %v566_v33  ;;  %v740_v35 = vpop.f32.mrb[19].mxu0 }
 0x1ba   :  { %642 = vst [vmem:[#allocation2 + $0x48] sm:$0xff] %v567_v34 }
 0x1c3   :  { %v611_v36 = vpop.f32.mrb[12].mxu1 }
 0x1c4   :  { %v612_v37 = vadd.f32 %v1175_v54, %v611_v36  ;;  %v763_v44 = vpop.f32.mrb[13].mxu1 }
 0x1c5   :  { %v614_v38 = vpop.f32.mrb[14].mxu1 }
 0x1c6   :  { %653 = vst [vmem:[#allocation2 + $0xa0] sm:$0xff] %v612_v37  ;;  %v615_v39 = vadd.f32 %v1175_v54, %v614_v38  ;;  %v764_v40 = vpop.f32.mrb[15].mxu1 }
 0x1c8   :  { %654 = vst [vmem:[#allocation2 + $0xa8] sm:$0xff] %v615_v39 }
 0x1cd   :  { %v571_v42 = vpop.f32.mrb[20].mxu0 }
 0x1ce   :  { %v572_v43 = vadd.f32 %v1175_v54, %v571_v42  ;;  %v743_v45 = vpop.f32.mrb[21].mxu0 }
 0x1cf   :  { %v574_v46 = vpop.f32.mrb[22].mxu0 }
 0x1d0   :  { %643 = vst [vmem:[#allocation2 + $0x50] sm:$0xff] %v572_v43  ;;  %v575_v47 = vadd.f32 %v1175_v54, %v574_v46  ;;  %v744_v48 = vpop.f32.mrb[23].mxu0 }
 0x1d2   :  { %644 = vst [vmem:[#allocation2 + $0x58] sm:$0xff] %v575_v47 }
 0x1db   :  { %v619_v51 = vpop.f32.mrb[16].mxu1 }
 0x1dc   :  { %v620_v53 = vadd.f32 %v1175_v54, %v619_v51  ;;  %v767_v5 = vpop.f32.mrb[17].mxu1 }
 0x1dd   :  { %v622_v55 = vpop.f32.mrb[18].mxu1 }
 0x1de   :  { %655 = vst [vmem:[#allocation2 + $0xb0] sm:$0xff] %v620_v53  ;;  %v623_v50 = vadd.f32 %v1175_v54, %v622_v55  ;;  %v768_v56 = vpop.f32.mrb[19].mxu1 }
 0x1e0   :  { %656 = vst [vmem:[#allocation2 + $0xb8] sm:$0xff] %v623_v50 }
 0x1e5   :  { %v579_v52 = vpop.f32.mrb[24].mxu0 }
 0x1e6   :  { %v580_v57 = vadd.f32 %v1175_v54, %v579_v52  ;;  %v747_v58 = vpop.f32.mrb[25].mxu0 }
 0x1e7   :  { %v582_v61 = vpop.f32.mrb[26].mxu0 }
 0x1e8   :  { %645 = vst [vmem:[#allocation2 + $0x60] sm:$0xff] %v580_v57  ;;  %v583_v59 = vadd.f32 %v1175_v54, %v582_v61  ;;  %v748_v60 = vpop.f32.mrb[27].mxu0 }
 0x1ea   :  { %646 = vst [vmem:[#allocation2 + $0x68] sm:$0xff] %v583_v59  ;;  %v627_v62 = vpop.f32.mrb[20].mxu1 }
 0x1eb   :  { %v628_v63 = vadd.f32 %v1175_v54, %v627_v62  ;;  %v771_v0 = vpop.f32.mrb[21].mxu1 }
 0x1ec   :  { %v630_v1 = vpop.f32.mrb[22].mxu1 }
 0x1ed   :  { %657 = vst [vmem:[#allocation2 + $0xc0] sm:$0xff] %v628_v63  ;;  %v772_v2 = vpop.f32.mrb[23].mxu1 }
 0x1ee   :  { %842 = shalt.err (!%p839_p4)
}
 0x1ef   :  { %s843_s14 = scalar_lea.hbm %s1219_s5, 3200 }
 0x1f0   :  { %p844_p5 = scmp.ne.s32.totalorder %s1219_s5, %s843_s14  ;;  %p847_p6 = scmp.lt.u32.totalorder %s843_s14, %s1219_s5 }
 0x1f2   :  { %p849_p7 = pnand %p847_p6, %p844_p5 }
 0x1f4   :  { %852 = shalt.err (!%p849_p7)
}
 0x1f5   :  { %s860_s19 = smov 128   ;;  %s861_s20 = smov 8  }
 0x1f6   :  { %669 = dma.vmem_to_hbm [thread:$0]  %s664_s10, 3200, %s1219_s5, [#allocation3], %s860_s19, %s860_s19, %s861_s20  }
 0x1f7   :  { %853 = dma.done.wait [#allocation3], 3200  }
 0x1f8   :  { %854 = vsyncadd [#allocation3], 4294964096 }
 0x1f9   :  { %673 = vsyncpa [#allocation3], 1 }

</bundles_post_ra>
